<compile_context>
chip_gen: v5e
topology: v5e:2x2
jax: 0.10.0
libtpu: 0.0.40
codegen_flags: <defaults>
</compile_context>

<pallas_src>
import jax
import jax.numpy as jnp
from jax.experimental import pallas as pl
from jax.experimental.pallas import tpu as pltpu


def mlp_kernel(x_ref, w1_ref, b1_ref, w2_ref, b2_ref, o_ref):
    # Hidden layer: Linear(in -> hidden) + ReLU, accumulated in f32 on the MXU.
    h = jnp.dot(x_ref[...], w1_ref[...], preferred_element_type=jnp.float32)
    h = jnp.maximum(h + b1_ref[...], 0.0)          # bias broadcast over batch, ReLU
    # Output layer: Linear(hidden -> out); f32 accumulation, single store.
    out = jnp.dot(h, w2_ref[...], preferred_element_type=jnp.float32) + b2_ref[...]
    o_ref[...] = out.astype(o_ref.dtype)


def my_sequential_forward(x, w1, b1, w2, b2, *, max_tile_m=256):
    """Linear(20->256) -> ReLU -> Linear(256->10) on a (batch, 20) input."""
    batch, in_dim = x.shape
    hidden = w1.shape[1]
    out_dim = w2.shape[1]

    # Batch (M) tiling: one tile for small batches (no pad, no slice); for large
    # batches tile at 256 so weights are DMA'd once per tile and the grid axis
    # can shard across TensorCores.
    if batch <= max_tile_m:
        tm = batch
        pad_m = 0
    else:
        tm = max_tile_m
        pad_m = (-batch) % tm
    x_in = jnp.pad(x, ((0, pad_m), (0, 0))) if pad_m else x
    padded_batch = batch + pad_m
    grid_m = padded_batch // tm

    flops = 2 * padded_batch * (in_dim * hidden + hidden * out_dim)
    bytes_accessed = 4 * (x_in.size
                          + grid_m * (w1.size + b1.size + w2.size + b2.size)
                          + padded_batch * out_dim)

    out = pl.pallas_call(
        mlp_kernel,
        out_shape=jax.ShapeDtypeStruct((padded_batch, out_dim), x.dtype),
        grid=(grid_m,),
        in_specs=[
            pl.BlockSpec((tm, in_dim), lambda i: (i, 0)),       # x: tiled over M
            pl.BlockSpec((in_dim, hidden), lambda i: (0, 0)),   # w1: resident
            pl.BlockSpec((1, hidden), lambda i: (0, 0)),        # b1: resident
            pl.BlockSpec((hidden, out_dim), lambda i: (0, 0)),  # w2: resident
            pl.BlockSpec((1, out_dim), lambda i: (0, 0)),       # b2: resident
        ],
        out_specs=pl.BlockSpec((tm, out_dim), lambda i: (i, 0)),
        compiler_params=pltpu.CompilerParams(
            dimension_semantics=("parallel",)),
        cost_estimate=pl.CostEstimate(
            flops=flops, transcendentals=0, bytes_accessed=bytes_accessed),
    )(x_in, w1, b1, w2, b2)

    return out[:batch] if pad_m else out


def init_params(key, in_dim=20, hidden=256, out_dim=10, dtype=jnp.float32):
    # Deterministic init mimicking nn.Linear's U(-1/sqrt(fan_in), 1/sqrt(fan_in)).
    # Weights stored (in, out) so y = x @ W + b (== PyTorch's x @ W.T).
    k1, k2, k3, k4 = jax.random.split(key, 4)
    lim1 = 1.0 / jnp.sqrt(jnp.asarray(in_dim, dtype))
    lim2 = 1.0 / jnp.sqrt(jnp.asarray(hidden, dtype))
    w1 = jax.random.uniform(k1, (in_dim, hidden), dtype, -lim1, lim1)
    b1 = jax.random.uniform(k2, (1, hidden), dtype, -lim1, lim1)
    w2 = jax.random.uniform(k3, (hidden, out_dim), dtype, -lim2, lim2)
    b2 = jax.random.uniform(k4, (1, out_dim), dtype, -lim2, lim2)
    return w1, b1, w2, b2


def reference_forward(x, w1, b1, w2, b2):
    hp = jax.lax.Precision.HIGHEST
    h = jnp.maximum(jnp.dot(x, w1, precision=hp) + b1, 0.0)
    return jnp.dot(h, w2, precision=hp) + b2


if __name__ == "__main__":
    key = jax.random.PRNGKey(0)
    kx, kp = jax.random.split(key)

    # Matches X = torch.rand(2, 20): batch=2, in_features=20.
    x = jax.random.uniform(kx, (2, 20), jnp.float32)
    w1, b1, w2, b2 = init_params(kp)

    out = my_sequential_forward(x, w1, b1, w2, b2)
    out = jax.block_until_ready(out)

    ref = reference_forward(x, w1, b1, w2, b2)
    assert out.shape == (2, 10), out.shape
    assert jnp.allclose(out, ref, atol=1e-4, rtol=1e-4), "mismatch vs JAX reference"

    print("KERNEL_OK")
</pallas_src>

<mosaic_0001>
module attributes {stable_mosaic.version = 11 : i64} {
  func.func @mlp_kernel(%arg0: i32, %arg1: memref<2x20xf32, #tpu.memory_space<vmem>>, %arg2: memref<20x256xf32, #tpu.memory_space<vmem>>, %arg3: memref<1x256xf32, #tpu.memory_space<vmem>>, %arg4: memref<256x10xf32, #tpu.memory_space<vmem>>, %arg5: memref<1x10xf32, #tpu.memory_space<vmem>>, %arg6: memref<2x10xf32, #tpu.memory_space<vmem>>) attributes {dimension_semantics = [#tpu.dimension_semantics<parallel>], iteration_bounds = array<i64: 1>, scalar_prefetch = 0 : i64, scratch_operands = 0 : i64, tpu.core_type = #tpu.core_type<tc>, window_params = [{transform_indices = @transform_0, window_bounds = array<i64: 2, 20>}, {pipeline_mode = #tpu.pipeline_mode<synchronous>, transform_indices = @transform_1, window_bounds = array<i64: 20, 256>}, {pipeline_mode = #tpu.pipeline_mode<synchronous>, transform_indices = @transform_2, window_bounds = array<i64: 1, 256>}, {pipeline_mode = #tpu.pipeline_mode<synchronous>, transform_indices = @transform_3, window_bounds = array<i64: 256, 10>}, {pipeline_mode = #tpu.pipeline_mode<synchronous>, transform_indices = @transform_4, window_bounds = array<i64: 1, 10>}, {transform_indices = @transform_5, window_bounds = array<i64: 2, 10>}]} {
    %c0 = arith.constant 0 : index
    %c0_0 = arith.constant 0 : index
    %0 = vector.load %arg1[%c0, %c0_0] : memref<2x20xf32, #tpu.memory_space<vmem>>, vector<2x20xf32>
    %c0_1 = arith.constant 0 : index
    %c0_2 = arith.constant 0 : index
    %1 = vector.load %arg2[%c0_1, %c0_2] : memref<20x256xf32, #tpu.memory_space<vmem>>, vector<20x256xf32>
    %cst = arith.constant dense<0.000000e+00> : vector<2x256xf32>
    %2 = tpu.matmul %0, %1, %cst {dimension_numbers = #tpu.dot_dimension_numbers<[1], [0], [0], [1], [0, 0, 1, 1], [], []>} : vector<2x20xf32>, vector<20x256xf32>, vector<2x256xf32> -> vector<2x256xf32>
    %c0_3 = arith.constant 0 : index
    %c0_4 = arith.constant 0 : index
    %3 = vector.load %arg3[%c0_3, %c0_4] : memref<1x256xf32, #tpu.memory_space<vmem>>, vector<1x256xf32>
    %4 = vector.broadcast %3 : vector<1x256xf32> to vector<2x256xf32>
    %5 = arith.addf %2, %4 : vector<2x256xf32>
    %cst_5 = arith.constant 0.000000e+00 : f32
    %6 = vector.broadcast %cst_5 : f32 to vector<2x256xf32>
    %7 = arith.maximumf %5, %6 : vector<2x256xf32>
    %c0_6 = arith.constant 0 : index
    %c0_7 = arith.constant 0 : index
    %8 = vector.load %arg4[%c0_6, %c0_7] : memref<256x10xf32, #tpu.memory_space<vmem>>, vector<256x10xf32>
    %cst_8 = arith.constant dense<0.000000e+00> : vector<2x10xf32>
    %9 = tpu.matmul %7, %8, %cst_8 {dimension_numbers = #tpu.dot_dimension_numbers<[1], [0], [0], [1], [0, 0, 1, 1], [], []>} : vector<2x256xf32>, vector<256x10xf32>, vector<2x10xf32> -> vector<2x10xf32>
    %c0_9 = arith.constant 0 : index
    %c0_10 = arith.constant 0 : index
    %10 = vector.load %arg5[%c0_9, %c0_10] : memref<1x10xf32, #tpu.memory_space<vmem>>, vector<1x10xf32>
    %11 = vector.broadcast %10 : vector<1x10xf32> to vector<2x10xf32>
    %12 = arith.addf %9, %11 : vector<2x10xf32>
    %c0_11 = arith.constant 0 : index
    %c0_12 = arith.constant 0 : index
    %13 = vector.load %arg6[%c0_11, %c0_12] : memref<2x10xf32, #tpu.memory_space<vmem>>, vector<2x10xf32>
    tpu.vector_store %arg6[%c0_11, %c0_12], %12 {strides = array<i32>} : memref<2x10xf32, #tpu.memory_space<vmem>>, vector<2x10xf32>,
    return
  }
  func.func @transform_0(%arg0: i32) -> (i32, i32) {
    %c0_i32 = arith.constant 0 : i32
    %c0_i32_0 = arith.constant 0 : i32
    return %arg0, %c0_i32 : i32, i32
  }
  func.func @transform_1(%arg0: i32) -> (i32, i32) {
    %c0_i32 = arith.constant 0 : i32
    %c0_i32_0 = arith.constant 0 : i32
    %c0_i32_1 = arith.constant 0 : i32
    return %c0_i32, %c0_i32_0 : i32, i32
  }
  func.func @transform_2(%arg0: i32) -> (i32, i32) {
    %c0_i32 = arith.constant 0 : i32
    %c0_i32_0 = arith.constant 0 : i32
    %c0_i32_1 = arith.constant 0 : i32
    return %c0_i32, %c0_i32_0 : i32, i32
  }
  func.func @transform_3(%arg0: i32) -> (i32, i32) {
    %c0_i32 = arith.constant 0 : i32
    %c0_i32_0 = arith.constant 0 : i32
    %c0_i32_1 = arith.constant 0 : i32
    return %c0_i32, %c0_i32_0 : i32, i32
  }
  func.func @transform_4(%arg0: i32) -> (i32, i32) {
    %c0_i32 = arith.constant 0 : i32
    %c0_i32_0 = arith.constant 0 : i32
    %c0_i32_1 = arith.constant 0 : i32
    return %c0_i32, %c0_i32_0 : i32, i32
  }
  func.func @transform_5(%arg0: i32) -> (i32, i32) {
    %c0_i32 = arith.constant 0 : i32
    %c0_i32_0 = arith.constant 0 : i32
    return %arg0, %c0_i32 : i32, i32
  }
}

</mosaic_0001>

<bundles_post_ra>
// kernel: tpu_custom_call.1
= control target key start
LH: loop header
LB: loop body
LE: loop exit
PB: predicated region body
PF: predicated region fallthrough
CT: control target
= control target key end

     0   :  { %vm38_vm0 = vcmask 1043456   ;;  %vm34_vm1 = vcmask 162816   ;;  %s370_s0 = inlined_call_operand.vmem [shape: f32[2,20], index: 0, kind: input, shape index: {}]   ;;  %s371_s1 = inlined_call_operand.vmem [shape: f32[20,256], index: 1, kind: input, shape index: {}]   ;;  %s372_s2 = inlined_call_operand.vmem [shape: f32[1,256], index: 2, kind: input, shape index: {}]   ;;  %s373_s3 = inlined_call_operand.vmem [shape: f32[256,10], index: 3, kind: input, shape index: {}]   ;;  %s374_s4 = inlined_call_operand.vmem [shape: f32[1,10], index: 4, kind: input, shape index: {}]   ;;  %s375_s5 = inlined_call_operand.hbm [shape: f32[2,10], index: 5, kind: output, shape index: {}]  }
   0x1   :  { %v26_v0 = vld [vmem:[%s371_s1 + $0x20] sm:$0xf]  ;;  %v24_v1 = vld [vmem:[%s371_s1 + $0x10] sm:$0xff]  ;;  %v27_v2 = vld [vmem:[%s371_s1 + $0x28] sm:$0xf] }
   0x2   :  { %181 = vmatpush.msk.msra.mxu0 %vm38_vm0, %v26_v0  ;;  %183 = vmatpush.msk.msra.mxu1 %vm38_vm0, %v27_v2  ;;  %v25_v3 = vld [vmem:[%s371_s1 + $0x18] sm:$0xff]  ;;  %v22_v4 = vld [vmem:[%s371_s1] sm:$0xff]  ;;  %v23_v5 = vld [vmem:[%s371_s1 + $0x8] sm:$0xff] }
   0x3   :  { %v102_v6 = vld [vmem:[%s373_s3 + $0x78] sm:$0xff]  ;;  %v21_v7 = vld [vmem:[%s370_s0] sm:$0x3]  ;;  %v101_v9 = vld [vmem:[%s373_s3 + $0x70] sm:$0xff] }
   0x4   :  { %59 = vmatpush.msra.mxu0 %v24_v1  ;;  %79 = vmatpush.msra.mxu1 %v25_v3  ;;  %v118_v8 = vld [vmem:[%s373_s3 + $0xf8] sm:$0xff]  ;;  %v117_v10 = vld [vmem:[%s373_s3 + $0xf0] sm:$0xff]  ;;  %v100_v11 = vld [vmem:[%s373_s3 + $0x68] sm:$0xff] }
   0x5   :  { %123 = vmatpush.msra.mxu2 %v102_v6  ;;  %143 = vmatpush.msra.mxu3 %v118_v8  ;;  %v116_v12 = vld [vmem:[%s373_s3 + $0xe8] sm:$0xff]  ;;  %v99_v13 = vld [vmem:[%s373_s3 + $0x60] sm:$0xff]  ;;  %v98_v15 = vld [vmem:[%s373_s3 + $0x58] sm:$0xff] }
   0x6   :  { %60 = vmatpush.msra.mxu0 %v22_v4  ;;  %80 = vmatpush.msra.mxu1 %v23_v5  ;;  %v115_v14 = vld [vmem:[%s373_s3 + $0xe0] sm:$0xff]  ;;  %v114_v16 = vld [vmem:[%s373_s3 + $0xd8] sm:$0xff] }
   0x7   :  { %182 = vmatmul.msk.f32.vlgmr.msra.gmra.mxu0 %vm34_vm1, %v21_v7  ;;  %184 = vmatmul.msk.f32.vlgmr.msra.gmra.mxu1 %vm34_vm1, %v21_v7 }
   0x8   :  { %124 = vmatpush.msra.mxu2 %v101_v9  ;;  %144 = vmatpush.msra.mxu3 %v117_v10 }
   0xa   :  { %125 = vmatpush.msra.mxu2 %v100_v11  ;;  %145 = vmatpush.msra.mxu3 %v116_v12 }
   0xc   :  { %126 = vmatpush.msra.mxu2 %v99_v13  ;;  %146 = vmatpush.msra.mxu3 %v115_v14 }
   0xd   :  { %10 = vsyncpa [#allocation3], 0  ;;  %v97_v17 = vld [vmem:[%s373_s3 + $0x50] sm:$0xff]  ;;  %v96_v19 = vld [vmem:[%s373_s3 + $0x48] sm:$0xff]  ;;  %s172_s21 = sshll.u32 %s375_s5, 4  ;;  %vm163_vm2 = vcmask 74752   ;;  %s173_s21 = int_to_ptr.hbm [resolvable:$true] %s172_s21 }
   0xe   :  { %v113_v18 = vld [vmem:[%s373_s3 + $0xd0] sm:$0xff]  ;;  %127 = vmatpush.msra.mxu2 %v98_v15  ;;  %147 = vmatpush.msra.mxu3 %v114_v16  ;;  %v112_v20 = vld [vmem:[%s373_s3 + $0xc8] sm:$0xff]  ;;  %v95_v21 = vld [vmem:[%s373_s3 + $0x40] sm:$0xff] }
   0xf   :  { %v111_v22 = vld [vmem:[%s373_s3 + $0xc0] sm:$0xff]  ;;  %v94_v23 = vld [vmem:[%s373_s3 + $0x38] sm:$0xff]  ;;  %v93_v25 = vld [vmem:[%s373_s3 + $0x30] sm:$0xff] }
  0x10   :  { %128 = vmatpush.msra.mxu2 %v97_v17  ;;  %148 = vmatpush.msra.mxu3 %v113_v18  ;;  %v110_v24 = vld [vmem:[%s373_s3 + $0xb8] sm:$0xff]  ;;  %v109_v26 = vld [vmem:[%s373_s3 + $0xb0] sm:$0xff]  ;;  %v92_v27 = vld [vmem:[%s373_s3 + $0x28] sm:$0xff] }
  0x11   :  { %v108_v28 = vld [vmem:[%s373_s3 + $0xa8] sm:$0xff]  ;;  %v91_v29 = vld [vmem:[%s373_s3 + $0x20] sm:$0xff]  ;;  %v90_v31 = vld [vmem:[%s373_s3 + $0x18] sm:$0xff] }
  0x12   :  { %129 = vmatpush.msra.mxu2 %v96_v19  ;;  %149 = vmatpush.msra.mxu3 %v112_v20  ;;  %v107_v30 = vld [vmem:[%s373_s3 + $0xa0] sm:$0xff]  ;;  %v89_v32 = vld [vmem:[%s373_s3 + $0x10] sm:$0xff]  ;;  %v106_v33 = vld [vmem:[%s373_s3 + $0x98] sm:$0xff] }
  0x13   :  { %v88_v34 = vld [vmem:[%s373_s3 + $0x8] sm:$0xff]  ;;  %v105_v35 = vld [vmem:[%s373_s3 + $0x90] sm:$0xff]  ;;  %v87_v36 = vld [vmem:[%s373_s3] sm:$0xff] }
  0x14   :  { %130 = vmatpush.msra.mxu2 %v95_v21  ;;  %150 = vmatpush.msra.mxu3 %v111_v22  ;;  %v104_v37 = vld [vmem:[%s373_s3 + $0x88] sm:$0xff]  ;;  %v103_v38 = vld [vmem:[%s373_s3 + $0x80] sm:$0xff]  ;;  %s213_s3 = smov [#allocation2]  }
  0x15   :  { %v28_v39 = vld [vmem:[%s372_s2] sm:$0x3]  ;;  %s170_s19 = sshll.u32 %s213_s3, 4  ;;  %s171_s19 = int_to_ptr.vmem [resolvable:$true] %s170_s19 }
  0x16   :  { %131 = vmatpush.msra.mxu2 %v94_v23  ;;  %151 = vmatpush.msra.mxu3 %v110_v24  ;;  %v30_v40 = vperm.slane %v28_v39, 0  ;;  %v31_v41 = vperm.slane %v28_v39, 1  ;;  %v186_v48 = vld [vmem:[%s374_s4] ss:$0 sm:$0xff] }
  0x18   :  { %132 = vmatpush.msra.mxu2 %v93_v25  ;;  %152 = vmatpush.msra.mxu3 %v109_v26 }
  0x1a   :  { %133 = vmatpush.msra.mxu2 %v92_v27  ;;  %153 = vmatpush.msra.mxu3 %v108_v28 }
  0x1c   :  { %134 = vmatpush.msra.mxu2 %v91_v29  ;;  %154 = vmatpush.msra.mxu3 %v107_v30 }
  0x1e   :  { %135 = vmatpush.msra.mxu2 %v90_v31  ;;  %155 = vmatpush.msra.mxu3 %v106_v33 }
  0x20   :  { %136 = vmatpush.msra.mxu2 %v89_v32  ;;  %156 = vmatpush.msra.mxu3 %v105_v35 }
  0x22   :  { %137 = vmatpush.msra.mxu2 %v88_v34  ;;  %157 = vmatpush.msra.mxu3 %v104_v37 }
  0x24   :  { %138 = vmatpush.msra.mxu2 %v87_v36  ;;  %158 = vmatpush.msra.mxu3 %v103_v38 }
  0x84   :  { %v62_v42 = vpop.f32.mrf.mxu0  ;;  %v82_v43 = vpop.f32.mrf.mxu1 }
  0x85   :  { %v63_v44 = vadd.f32 %v62_v42, %v30_v40  ;;  %v83_v45 = vadd.f32 %v82_v43, %v31_v41 }
  0x87   :  { %v85_v46 = vmax.f32 %v63_v44, 0.0  ;;  %v86_v47 = vmax.f32 %v83_v45, 0.0 }
  0x89   :  { %139 = vmatmul.f32.vlgmr.msra.gmra.mxu2 %v85_v46  ;;  %159 = vmatmul.f32.vlgmr.msra.gmra.mxu3 %v86_v47 }
 0x10c   :  { %v140_v49 = vpop.f32.mrf.mxu2  ;;  %v160_v50 = vpop.f32.mrf.mxu3 }
 0x10d   :  { %v141_v51 = vadd.f32 %v186_v48, %v140_v49 }
 0x10f   :  { %v161_v52 = vadd.f32 %v160_v50, %v141_v51 }
 0x111   :  { %164 = vst.msk [vmem:[#allocation2] sm:$0x3] %vm163_vm2, %v161_v52 }
 0x112   :  { %175 = dma.vmem_to_hbm [thread:$0]  %s171_s19, 32, %s173_s21, [#allocation3]  }
 0x113   :  { %211 = dma.done.wait [#allocation3], 32  }
 0x114   :  { %212 = vsyncadd [#allocation3], 4294967264 }
 0x115   :  { %180 = vsyncpa [#allocation3], 1 }

</bundles_post_ra>
